<compile_context>
chip_gen: v7x
topology: tpu7x:2x2x1
jax: 0.10.0
libtpu: 0.0.40
codegen_flags: <defaults>
</compile_context>

<pallas_src>
import jax
import jax.numpy as jnp
from jax import lax
from jax.experimental import pallas as pl
from jax.experimental.pallas import tpu as pltpu


def _round_up(x, m):
    return ((x + m - 1) // m) * m


def net_kernel(x_ref, w1T_ref, b1_ref, w2_ref, b2_ref, o_ref):
    """One batch tile of relu(relu(x @ W1 + b1) @ w2 + b2), batch on lanes.

    x_ref  : (TB, D_in)  -- native layout, streamed from HBM once
    w1T_ref: (H, D_in)   -- VMEM-resident across the grid
    b1_ref : (H, 1)
    w2_ref : (H, 1)
    b2_ref : (1, 1)      -- SMEM scalar
    o_ref  : (1, TB)     -- lane-dense output slab
    """
    # fc1 on the MXU: contract D_in of (H, D_in) with D_in of (TB, D_in)
    # -> (H, TB).  The x "transpose" happens on-chip (folded into the MXU
    # operand feed), not as an extra XLA HBM pass.
    h = lax.dot_general(
        w1T_ref[...], x_ref[...],
        dimension_numbers=(((1,), (1,)), ((), ())),
        preferred_element_type=jnp.float32)
    h = jnp.maximum(h + b1_ref[...], 0.0)

    # fc2 has output dim 1: skip the MXU.  VPU broadcast-multiply + XLU
    # sublane reduce over H keeps the result lane-dense across the batch.
    out = jnp.sum(h * w2_ref[...], axis=0, keepdims=True)        # (1, TB)
    out = out + b2_ref[0, 0]
    o_ref[...] = jnp.maximum(out, 0.0).astype(o_ref.dtype)


def _choose_batch_tile(B, tb_max):
    """Pick a multiple-of-128 batch tile; keep the tile count even (>=2 for
    nontrivial B) so v7x's two TensorCores stay balanced (no-op on v5e/v6e)."""
    n = max(pl.cdiv(B, tb_max), 1)
    if n == 1 and B > 128:
        n = 2            # use both v7x TCs when there's enough work
    if n > 1 and n % 2 == 1:
        n += 1           # avoid a 2:1 imbalance across the two TCs
    tb = min(tb_max, _round_up(pl.cdiv(B, n), 128))
    return max(tb, 128)


def net_forward(x, w1, b1, w2, b2, *, tb=8192):
    """Full MLP forward pass via a batch-tiled Pallas kernel.

    x:  (B, D_in)  float32
    w1: (D_in, H)  float32     (nn.Linear weight, stored transposed)
    b1: (1, H)     float32
    w2: (H, 1)     float32
    b2: (1, 1)     float32
    returns (B, 1) float32
    """
    B, D_in = x.shape
    H = w1.shape[1]

    tb_eff = _choose_batch_tile(B, tb)
    grid = (pl.cdiv(B, tb_eff),)   # partial last tile is clipped on writeback

    # Only the tiny parameters get reshaped in the wrapper; x is fed as-is.
    w1T = w1.T                     # (H, D_in)
    b1c = b1.reshape(H, 1)         # (H, 1)
    w2c = w2.reshape(H, 1)         # (H, 1)
    b2s = b2.reshape(1, 1)         # (1, 1) -> SMEM scalar

    out_t = pl.pallas_call(
        net_kernel,
        out_shape=jax.ShapeDtypeStruct((1, B), jnp.float32),
        grid=grid,
        in_specs=[
            # Activations: streamed once, tiled over batch in native layout.
            pl.BlockSpec((tb_eff, D_in), lambda i: (i, 0)),
            # Weights / biases: same block every step -> stay VMEM-resident.
            pl.BlockSpec((H, D_in), lambda i: (0, 0)),
            pl.BlockSpec((H, 1), lambda i: (0, 0)),
            pl.BlockSpec((H, 1), lambda i: (0, 0)),
            # Scalar fc2 bias in SMEM (no padded VMEM tile / vector load).
            pl.BlockSpec(memory_space=pltpu.SMEM),
        ],
        # Lane-dense output slab: batch on the 128-wide lane axis.
        out_specs=pl.BlockSpec((1, tb_eff), lambda i: (0, i)),
        compiler_params=pltpu.CompilerParams(
            # Batch tiles are independent: shards across the 2 TCs on v7x,
            # free flag on single-TC v5e/v6e.
            dimension_semantics=("parallel",),
        ),
    )(x, w1T, b1c, w2c, b2s)

    return out_t.T                                    # (B, 1), tiny transpose


def init_params(key, input_size, hidden_size):
    """Deterministic init matching torch.nn.Linear's U(-1/sqrt(fan_in), +) scheme."""
    k1, k2, k3, k4 = jax.random.split(key, 4)
    bound1 = 1.0 / jnp.sqrt(jnp.float32(input_size))
    bound2 = 1.0 / jnp.sqrt(jnp.float32(hidden_size))
    w1 = jax.random.uniform(k1, (input_size, hidden_size), jnp.float32,
                            -bound1, bound1)
    b1 = jax.random.uniform(k2, (1, hidden_size), jnp.float32, -bound1, bound1)
    w2 = jax.random.uniform(k3, (hidden_size, 1), jnp.float32, -bound2, bound2)
    b2 = jax.random.uniform(k4, (1, 1), jnp.float32, -bound2, bound2)
    return w1, b1, w2, b2


if __name__ == "__main__":
    key = jax.random.PRNGKey(0)
    kx, kp = jax.random.split(key)

    batch, input_size, hidden_size = 8, 8, 32
    x = jax.random.normal(kx, (batch, input_size), jnp.float32)
    w1, b1, w2, b2 = init_params(kp, input_size, hidden_size)

    out = net_forward(x, w1, b1, w2, b2)
    out = jax.block_until_ready(out)

    # Reference check in plain JAX (same math as the PyTorch module).
    ref = jnp.maximum(jnp.maximum(x @ w1 + b1, 0.0) @ w2 + b2, 0.0)
    assert out.shape == (batch, 1), out.shape
    assert jnp.allclose(out, ref, atol=1e-5, rtol=1e-5)

    # Also exercise a batch that spans multiple grid tiles + a partial tile.
    big_batch = 1500
    xb = jax.random.normal(kx, (big_batch, input_size), jnp.float32)
    outb = jax.block_until_ready(net_forward(xb, w1, b1, w2, b2))
    refb = jnp.maximum(jnp.maximum(xb @ w1 + b1, 0.0) @ w2 + b2, 0.0)
    assert outb.shape == (big_batch, 1), outb.shape
    assert jnp.allclose(outb, refb, atol=1e-5, rtol=1e-5)

    print("KERNEL_OK")
</pallas_src>

<mosaic_0001>
module attributes {stable_mosaic.version = 11 : i64} {
  func.func @net_kernel(%arg0: i32, %arg1: memref<128x8xf32, #tpu.memory_space<vmem>>, %arg2: memref<32x8xf32, #tpu.memory_space<vmem>>, %arg3: memref<32x1xf32, #tpu.memory_space<vmem>>, %arg4: memref<32x1xf32, #tpu.memory_space<vmem>>, %arg5: memref<1x1xf32, #tpu.memory_space<smem>>, %arg6: memref<1x128xf32, #tpu.memory_space<vmem>>) attributes {dimension_semantics = [#tpu.dimension_semantics<parallel>], iteration_bounds = array<i64: 1>, scalar_prefetch = 0 : i64, scratch_operands = 0 : i64, tpu.core_type = #tpu.core_type<tc>, window_params = [{transform_indices = @transform_0, window_bounds = array<i64: 128, 8>}, {pipeline_mode = #tpu.pipeline_mode<synchronous>, transform_indices = @transform_1, window_bounds = array<i64: 32, 8>}, {pipeline_mode = #tpu.pipeline_mode<synchronous>, transform_indices = @transform_2, window_bounds = array<i64: 32, 1>}, {pipeline_mode = #tpu.pipeline_mode<synchronous>, transform_indices = @transform_3, window_bounds = array<i64: 32, 1>}, {transform_indices = @transform_4, window_bounds = array<i64: 1, 1>}, {transform_indices = @transform_5, window_bounds = array<i64: 1, 128>}]} {
    %c0 = arith.constant 0 : index
    %c0_0 = arith.constant 0 : index
    %0 = vector.load %arg2[%c0, %c0_0] : memref<32x8xf32, #tpu.memory_space<vmem>>, vector<32x8xf32>
    %c0_1 = arith.constant 0 : index
    %c0_2 = arith.constant 0 : index
    %1 = vector.load %arg1[%c0_1, %c0_2] : memref<128x8xf32, #tpu.memory_space<vmem>>, vector<128x8xf32>
    %cst = arith.constant dense<0.000000e+00> : vector<32x128xf32>
    %2 = tpu.matmul %0, %1, %cst {dimension_numbers = #tpu.dot_dimension_numbers<[1], [1], [0], [0], [0, 0, 1, 0], [], []>} : vector<32x8xf32>, vector<128x8xf32>, vector<32x128xf32> -> vector<32x128xf32>
    %c0_3 = arith.constant 0 : index
    %c0_4 = arith.constant 0 : index
    %3 = vector.load %arg3[%c0_3, %c0_4] : memref<32x1xf32, #tpu.memory_space<vmem>>, vector<32x1xf32>
    %4 = vector.broadcast %3 : vector<32x1xf32> to vector<32x128xf32>
    %5 = arith.addf %2, %4 : vector<32x128xf32>
    %cst_5 = arith.constant 0.000000e+00 : f32
    %6 = vector.broadcast %cst_5 : f32 to vector<32x128xf32>
    %7 = arith.maximumf %5, %6 : vector<32x128xf32>
    %c0_6 = arith.constant 0 : index
    %c0_7 = arith.constant 0 : index
    %8 = vector.load %arg4[%c0_6, %c0_7] : memref<32x1xf32, #tpu.memory_space<vmem>>, vector<32x1xf32>
    %9 = vector.broadcast %8 : vector<32x1xf32> to vector<32x128xf32>
    %10 = arith.mulf %7, %9 : vector<32x128xf32>
    %cst_8 = arith.constant dense<0.000000e+00> : vector<128xf32>
    %11 = vector.multi_reduction <add>, %10, %cst_8 [0] : vector<32x128xf32> to vector<128xf32>
    %12 = vector.shape_cast %11 : vector<128xf32> to vector<1x128xf32>
    %c0_9 = arith.constant 0 : index
    %c0_10 = arith.constant 0 : index
    %13 = memref.load %arg5[%c0_9, %c0_10] : memref<1x1xf32, #tpu.memory_space<smem>>
    %14 = vector.broadcast %13 : f32 to vector<1x128xf32>
    %15 = arith.addf %12, %14 : vector<1x128xf32>
    %cst_11 = arith.constant 0.000000e+00 : f32
    %16 = vector.broadcast %cst_11 : f32 to vector<1x128xf32>
    %17 = arith.maximumf %15, %16 : vector<1x128xf32>
    %c0_12 = arith.constant 0 : index
    %c0_13 = arith.constant 0 : index
    %18 = vector.load %arg6[%c0_12, %c0_13] : memref<1x128xf32, #tpu.memory_space<vmem>>, vector<1x128xf32>
    tpu.vector_store %arg6[%c0_12, %c0_13], %17 {strides = array<i32>} : memref<1x128xf32, #tpu.memory_space<vmem>>, vector<1x128xf32>,
    return
  }
  func.func @transform_0(%arg0: i32) -> (i32, i32) {
    %c0_i32 = arith.constant 0 : i32
    %c0_i32_0 = arith.constant 0 : i32
    return %arg0, %c0_i32 : i32, i32
  }
  func.func @transform_1(%arg0: i32) -> (i32, i32) {
    %c0_i32 = arith.constant 0 : i32
    %c0_i32_0 = arith.constant 0 : i32
    %c0_i32_1 = arith.constant 0 : i32
    return %c0_i32, %c0_i32_0 : i32, i32
  }
  func.func @transform_2(%arg0: i32) -> (i32, i32) {
    %c0_i32 = arith.constant 0 : i32
    %c0_i32_0 = arith.constant 0 : i32
    %c0_i32_1 = arith.constant 0 : i32
    return %c0_i32, %c0_i32_0 : i32, i32
  }
  func.func @transform_3(%arg0: i32) -> (i32, i32) {
    %c0_i32 = arith.constant 0 : i32
    %c0_i32_0 = arith.constant 0 : i32
    %c0_i32_1 = arith.constant 0 : i32
    return %c0_i32, %c0_i32_0 : i32, i32
  }
  func.func @transform_4(%arg0: i32) -> (i32, i32) {
    %c0_i32 = arith.constant 0 : i32
    %c0_i32_0 = arith.constant 0 : i32
    %c0_i32_1 = arith.constant 0 : i32
    return %c0_i32, %c0_i32_0 : i32, i32
  }
  func.func @transform_5(%arg0: i32) -> (i32, i32) {
    %c0_i32 = arith.constant 0 : i32
    %c0_i32_0 = arith.constant 0 : i32
    return %c0_i32, %arg0 : i32, i32
  }
}

</mosaic_0001>

<bundles_post_ra>
// kernel: tpu_custom_call.1
= control target key start
LH: loop header
LB: loop body
LE: loop exit
PB: predicated region body
PF: predicated region fallthrough
CT: control target
= control target key end

     0   :  { %vm66_vm0 = vcmask 64512   ;;  %v442_v6 = vmov 0   ;;  %s647_s0 = inlined_call_operand.vmem [shape: f32[8,8], index: 0, kind: input, shape index: {}]   ;;  %s648_s1 = inlined_call_operand.vmem [shape: f32[32,8], index: 1, kind: input, shape index: {}]   ;;  %s649_s2 = inlined_call_operand.vmem [shape: f32[32,1], index: 2, kind: input, shape index: {}]   ;;  %s650_s3 = inlined_call_operand.vmem [shape: f32[32,1], index: 3, kind: input, shape index: {}]   ;;  %s651_s4 = inlined_call_operand.<no memory space> [shape: f32[1,1], index: 4, kind: input, shape index: {}]   ;;  %s652_s5 = inlined_call_operand.hbm [shape: f32[1,8], index: 5, kind: output, shape index: {}]  }
   0x1   :  { %v26_v0 = vld [vmem:[%s647_s0] sm:$0xff]  ;;  %v27_v1 = vld [vmem:[%s647_s0 + $0x8] sm:$0xff]  ;;  %v28_v2 = vld [vmem:[%s647_s0 + $0x10] sm:$0xff]  ;;  %416 = vset.pattern.permute.xlu0 %v442_v6  ;;  %417 = vset.pattern.permute.xlu1 %v442_v6 }
   0x2   :  { %v350_v3 = vpack.c.bf16 %v27_v1, %v26_v0  ;;  %vm485_vm1 = vmpackc.low %vm66_vm0, %vm66_vm0  ;;  %v29_v5 = vld [vmem:[%s647_s0 + $0x18] sm:$0xff]  ;;  %v22_v8 = vld [vmem:[%s648_s1] sm:$0xff] }
   0x3   :  { %v356_v7 = vpack.c.bf16 %v29_v5, %v28_v2  ;;  %v30_v9 = vld [vmem:[%s647_s0 + $0x20] sm:$0xff]  ;;  %v31_v10 = vld [vmem:[%s647_s0 + $0x28] sm:$0xff]  ;;  %344 = vmatprep.mubr.msk.f32.mxu0 %vm66_vm0, %v22_v8  ;;  %v24_v11 = vld [vmem:[%s648_s1 + $0x10] sm:$0xff] }
   0x4   :  { %352 = vmatprep.subr.msk.bf16.mxu0 %vm485_vm1, %v350_v3  ;;  %398 = vmatprep.subr.msk.bf16.mxu1 %vm485_vm1, %v350_v3  ;;  %v42_v12 = vld [vmem:[%s649_s2] sm:$0xff]  ;;  %v44_v13 = vld [vmem:[%s649_s2 + $0x10] sm:$0xff]  ;;  %v362_v14 = vpack.c.bf16 %v31_v10, %v30_v9 }
   0x5   :  { %355 = vmatpush3.bf16.xpose.msk.msra.mxu0 %vm485_vm1, %v350_v3  ;;  %406 = vmatpush3.bf16.xpose.msk.msra.mxu1 %vm485_vm1, %v350_v3 }
   0x6   :  { %358 = vmatprep.subr.msk.bf16.mxu0 %vm485_vm1, %v356_v7  ;;  %399 = vmatprep.subr.msk.bf16.mxu1 %vm485_vm1, %v356_v7 }
   0x7   :  { %347 = vmatprep.mubr.msk.f32.mxu1 %vm66_vm0, %v24_v11  ;;  %48 = vperm.xlu0 %416, %v42_v12  }
   0x8   :  { %58 = vperm.xlu1 %417, %v44_v13  }
   0x9   :  { %11 = vsyncpa [#allocation4], 0  ;;  %v43_v15 = vld [vmem:[%s649_s2 + $0x8] sm:$0xff]  ;;  %v45_v16 = vld [vmem:[%s649_s2 + $0x18] sm:$0xff]  ;;  %v254_v6 = vstv %s651_s4  ;;  %s443_s21 = smov [#allocation3]  }
   0xa   :  { %v32_v17 = vld [vmem:[%s647_s0 + $0x30] sm:$0xff]  ;;  %v33_v18 = vld [vmem:[%s647_s0 + $0x38] sm:$0xff]  ;;  %v216_v19 = vld [vmem:[%s650_s3] sm:$0xff]  ;;  %s264_s22 = sshll.u32 %s443_s21, 4  ;;  %s265_s22 = int_to_ptr.vmem [resolvable:$true] %s264_s22 }
   0xb   :  { %53 = vperm.xlu0 %416, %v43_v15   ;;  %v217_v20 = vld [vmem:[%s650_s3 + $0x8] sm:$0xff]  ;;  %v368_v21 = vpack.c.bf16 %v33_v18, %v32_v17  ;;  %v218_v22 = vld [vmem:[%s650_s3 + $0x10] sm:$0xff]  ;;  %v219_v23 = vld [vmem:[%s650_s3 + $0x18] sm:$0xff]  ;;  %s418_s23 = scalar_lea.vmem %s265_s22, 16  ;;  %s422_s24 = scalar_lea.vmem %s265_s22, 32 }
   0xc   :  { %63 = vperm.xlu1 %417, %v45_v16   ;;  %v34_v24 = vld [vmem:[%s647_s0 + $0x40] sm:$0xff]  ;;  %v35_v25 = vld [vmem:[%s647_s0 + $0x48] sm:$0xff]  ;;  %v36_v27 = vld [vmem:[%s647_s0 + $0x50] sm:$0xff]  ;;  %p419_p0 = scmp.ne.s32.totalorder %s265_s22, %s418_s23  ;;  %p423_p1 = scmp.lt.s32.totalorder %s265_s22, %s265_s22 }
   0xd   :  { %361 = vmatpush3.bf16.xpose.msk.msra.mxu0 %vm485_vm1, %v356_v7  ;;  %407 = vmatpush3.bf16.xpose.msk.msra.mxu1 %vm485_vm1, %v356_v7  ;;  %v374_v26 = vpack.c.bf16 %v35_v25, %v34_v24  ;;  %v37_v28 = vld [vmem:[%s647_s0 + $0x58] sm:$0xff]  ;;  %v38_v30 = vld [vmem:[%s647_s0 + $0x60] sm:$0xff]  ;;  %v39_v31 = vld [vmem:[%s647_s0 + $0x68] sm:$0xff]  ;;  %p424_p2 = scmp.lt.s32.totalorder %s422_s24, %s418_s23 }
   0xe   :  { %364 = vmatprep.subr.msk.bf16.mxu0 %vm485_vm1, %v362_v14  ;;  %400 = vmatprep.subr.msk.bf16.mxu1 %vm485_vm1, %v362_v14  ;;  %v380_v29 = vpack.c.bf16 %v37_v28, %v36_v27  ;;  %v386_v32 = vpack.c.bf16 %v39_v31, %v38_v30  ;;  %v40_v33 = vld [vmem:[%s647_s0 + $0x70] sm:$0xff]  ;;  %v41_v34 = vld [vmem:[%s647_s0 + $0x78] sm:$0xff]  ;;  %v23_v36 = vld [vmem:[%s648_s1 + $0x8] sm:$0xff] }
   0xf   :  { %222 = vperm.xlu0 %416, %v216_v19   ;;  %v392_v35 = vpack.c.bf16 %v41_v34, %v40_v33  ;;  %v25_v37 = vld [vmem:[%s648_s1 + $0x18] sm:$0xff]  ;;  %p425_p3 = por %p424_p2, %p423_p1 }
  0x10   :  { %227 = vperm.xlu1 %417, %v217_v20  }
  0x11   :  { %p426_p4 = pnand %p425_p3, %p419_p0 }
  0x13   :  { %232 = vperm.xlu0 %416, %v218_v22  }
  0x14   :  { %237 = vperm.xlu1 %417, %v219_v23  }
  0x15   :  { %367 = vmatpush3.bf16.xpose.msk.msra.mxu0 %vm485_vm1, %v362_v14  ;;  %408 = vmatpush3.bf16.xpose.msk.msra.mxu1 %vm485_vm1, %v362_v14 }
  0x16   :  { %370 = vmatprep.subr.msk.bf16.mxu0 %vm485_vm1, %v368_v21  ;;  %401 = vmatprep.subr.msk.bf16.mxu1 %vm485_vm1, %v368_v21 }
  0x1d   :  { %373 = vmatpush3.bf16.xpose.msk.msra.mxu0 %vm485_vm1, %v368_v21  ;;  %409 = vmatpush3.bf16.xpose.msk.msra.mxu1 %vm485_vm1, %v368_v21 }
  0x1e   :  { %376 = vmatprep.subr.msk.bf16.mxu0 %vm485_vm1, %v374_v26  ;;  %402 = vmatprep.subr.msk.bf16.mxu1 %vm485_vm1, %v374_v26 }
  0x25   :  { %379 = vmatpush3.bf16.xpose.msk.msra.mxu0 %vm485_vm1, %v374_v26  ;;  %410 = vmatpush3.bf16.xpose.msk.msra.mxu1 %vm485_vm1, %v374_v26 }
  0x26   :  { %382 = vmatprep.subr.msk.bf16.mxu0 %vm485_vm1, %v380_v29  ;;  %403 = vmatprep.subr.msk.bf16.mxu1 %vm485_vm1, %v380_v29 }
  0x2d   :  { %385 = vmatpush3.bf16.xpose.msk.msra.mxu0 %vm485_vm1, %v380_v29  ;;  %411 = vmatpush3.bf16.xpose.msk.msra.mxu1 %vm485_vm1, %v380_v29 }
  0x2e   :  { %388 = vmatprep.subr.msk.bf16.mxu0 %vm485_vm1, %v386_v32  ;;  %404 = vmatprep.subr.msk.bf16.mxu1 %vm485_vm1, %v386_v32 }
  0x35   :  { %391 = vmatpush3.bf16.xpose.msk.msra.mxu0 %vm485_vm1, %v386_v32  ;;  %412 = vmatpush3.bf16.xpose.msk.msra.mxu1 %vm485_vm1, %v386_v32 }
  0x36   :  { %394 = vmatprep.subr.msk.bf16.mxu0 %vm485_vm1, %v392_v35  ;;  %405 = vmatprep.subr.msk.bf16.mxu1 %vm485_vm1, %v392_v35 }
  0x3d   :  { %397 = vmatpush3.bf16.xpose.msk.msra.mxu0 %vm485_vm1, %v392_v35  ;;  %413 = vmatpush3.bf16.xpose.msk.msra.mxu1 %vm485_vm1, %v392_v35 }
  0x44   :  { %345 = vmatmul.mubr.msk.f32.vlgmr.msra.gmra.mrb[0].mxu0 %vm66_vm0, %v23_v36  ;;  %348 = vmatmul.mubr.msk.f32.vlgmr.msra.gmra.mrb[0].mxu1 %vm66_vm0, %v25_v37 }
  0x86   :  { %v49_v38 = vpop.permute.xlu0 %48 }
  0x87   :  { %v59_v39 = vpop.permute.xlu1 %58 }
  0x8a   :  { %v54_v40 = vpop.permute.xlu0 %53 }
  0x8b   :  { %v64_v41 = vpop.permute.xlu1 %63 }
  0x8e   :  { %v223_v42 = vpop.permute.xlu0 %222 }
  0x8f   :  { %v228_v51 = vpop.permute.xlu1 %227 }
  0x92   :  { %v233_v58 = vpop.permute.xlu0 %232 }
  0x93   :  { %v238_v61 = vpop.permute.xlu1 %237 }
 0x117   :  { %v346_v43 = vpop.f32.mrb[0].mxu0  ;;  %v349_v44 = vpop.f32.mrb[0].mxu1 }
 0x118   :  { %v199_v45 = vadd.f32 %v346_v43, %v54_v40  ;;  %v193_v46 = vpop.f32.mrb[1].mxu0  ;;  %v203_v47 = vpop.f32.mrb[1].mxu1  ;;  %v209_v48 = vadd.f32 %v349_v44, %v64_v41 }
 0x119   :  { %v194_v49 = vadd.f32 %v193_v46, %v49_v38  ;;  %v204_v50 = vadd.f32 %v203_v47, %v59_v39 }
 0x11a   :  { %v213_v52 = vmax.f32 %v199_v45, 0.0  ;;  %v215_v56 = vmax.f32 %v209_v48, 0.0 }
 0x11b   :  { %v212_v53 = vmax.f32 %v194_v49, 0.0  ;;  %v214_v54 = vmax.f32 %v204_v50, 0.0 }
 0x11c   :  { %v241_v55 = vmul.f32 %v228_v51, %v213_v52  ;;  %v243_v62 = vmul.f32 %v238_v61, %v215_v56 }
 0x11d   :  { %v240_v57 = vmul.f32 %v223_v42, %v212_v53  ;;  %v242_v60 = vmul.f32 %v233_v58, %v214_v54 }
 0x11f   :  { %v244_v59 = vadd.f32 %v241_v55, %v240_v57 }
 0x121   :  { %v245_v63 = vadd.f32 %v244_v59, %v242_v60 }
 0x123   :  { %v246_v0 = vadd.f32 %v245_v63, %v243_v62 }
 0x125   :  { %v247_v1 = vrot.slane %v246_v0, 4 }
 0x127   :  { %v248_v2 = vadd.f32 %v247_v1, %v246_v0 }
 0x129   :  { %v249_v3 = vrot.slane %v248_v2, 2 }
 0x12b   :  { %v250_v4 = vadd.f32 %v249_v3, %v248_v2 }
 0x12d   :  { %v251_v5 = vrot.slane %v250_v4, 1 }
 0x12f   :  { %v252_v7 = vadd.f32 %v251_v5, %v250_v4 }
 0x131   :  { %v255_v8 = vadd.f32 %v254_v6, %v252_v7 }
 0x133   :  { %v256_v9 = vmax.f32 %v255_v8, 0.0 }
 0x135   :  { %257 = vst [vmem:[#allocation3] sm:$0x1] %v256_v9 }
 0x136   :  { %429 = shalt.err (!%p426_p4)
}
 0x137   :  { %s430_s27 = scalar_lea.hbm %s652_s5, 16 }
 0x138   :  { %p431_p5 = scmp.ne.s32.totalorder %s652_s5, %s430_s27  ;;  %p434_p6 = scmp.lt.u32.totalorder %s430_s27, %s652_s5 }
 0x13a   :  { %p436_p7 = pnand %p434_p6, %p431_p5 }
 0x13c   :  { %439 = shalt.err (!%p436_p7)
}
 0x13d   :  { %267 = dma.vmem_to_hbm [thread:$0]  %s265_s22, 16, %s652_s5, [#allocation4]  }
 0x13e   :  { %440 = dma.done.wait [#allocation4], 16  }
 0x13f   :  { %441 = vsyncadd [#allocation4], 4294967280 }
 0x140   :  { %271 = vsyncpa [#allocation4], 1 }

</bundles_post_ra>
